<compile_context>
chip_gen: v5e
topology: v5e:2x2
jax: 0.10.0
libtpu: 0.0.40
codegen_flags: <defaults>
</compile_context>

<pallas_src>
import functools

import jax
import jax.numpy as jnp
from jax.experimental import pallas as pl
from jax.experimental.pallas import tpu as pltpu

_LANE = 128


def _sigmoid(h):
    # exp -> EUP, approx reciprocal -> EUP; avoids the VPU Newton-refined divide.
    return pl.reciprocal(1.0 + jnp.exp(-h), approx=True)


def _discriminator_kernel(x_ref, w1_ref, b1_ref, w2_ref, b2_ref,
                          w3_ref, b3_ref, o_ref):
    # Layer 1: bf16 matmul inputs, f32 accumulate / elementwise.
    h = jnp.dot(x_ref[...], w1_ref[...],
                preferred_element_type=jnp.float32) + b1_ref[...]
    h = _sigmoid(h)
    # Layer 2.
    h = jnp.dot(h.astype(jnp.bfloat16), w2_ref[...],
                preferred_element_type=jnp.float32) + b2_ref[...]
    h = _sigmoid(h)
    # Layer 3 (output width padded to a multiple of 128 lanes -> unmasked stores).
    h = jnp.dot(h.astype(jnp.bfloat16), w3_ref[...],
                preferred_element_type=jnp.float32) + b3_ref[...]
    o_ref[...] = _sigmoid(h).astype(o_ref.dtype)


@functools.partial(jax.jit, static_argnames=("batch_tile",))
def discriminator_forward(x, params, *, batch_tile=None):
    """Forward pass of the Discriminator.

    x: [B, input_size] float32.
    params: dict with w1,b1,w2,b2,w3,b3; weights are [in, out]
            (transposed relative to PyTorch nn.Linear's [out, in]),
            biases are [1, out]. Activation f is sigmoid.
    """
    B, in_size = x.shape
    hidden = params["w1"].shape[1]
    out_size = params["w3"].shape[1]

    if batch_tile is None:
        batch_tile = min(B, 512)
    assert B % batch_tile == 0, "B must be a multiple of batch_tile"

    # Pad the output width to a multiple of 128 so the final store is lane-dense.
    out_pad = ((out_size + _LANE - 1) // _LANE) * _LANE
    w3 = params["w3"]
    b3 = params["b3"]
    if out_pad != out_size:
        w3 = jnp.pad(w3, ((0, 0), (0, out_pad - out_size)))
        b3 = jnp.pad(b3, ((0, 0), (0, out_pad - out_size)))

    # bf16 matmul operands (halves weight/activation DMA bytes); biases stay f32.
    x_bf = x.astype(jnp.bfloat16)
    w1 = params["w1"].astype(jnp.bfloat16)
    w2 = params["w2"].astype(jnp.bfloat16)
    w3 = w3.astype(jnp.bfloat16)
    b1, b2 = params["b1"], params["b2"]

    grid = (B // batch_tile,)

    # Activations tiled over batch; weights/biases fully resident (constant index_map,
    # so Pallas does not re-DMA them per grid step).
    x_spec = pl.BlockSpec((batch_tile, in_size), lambda i: (i, 0))
    w1_spec = pl.BlockSpec((in_size, hidden), lambda i: (0, 0))
    b1_spec = pl.BlockSpec((1, hidden), lambda i: (0, 0))
    w2_spec = pl.BlockSpec((hidden, hidden), lambda i: (0, 0))
    b2_spec = pl.BlockSpec((1, hidden), lambda i: (0, 0))
    w3_spec = pl.BlockSpec((hidden, out_pad), lambda i: (0, 0))
    b3_spec = pl.BlockSpec((1, out_pad), lambda i: (0, 0))
    out_spec = pl.BlockSpec((batch_tile, out_pad), lambda i: (i, 0))

    flops = 2 * B * (in_size * hidden + hidden * hidden + hidden * out_pad)
    transcendentals = B * (2 * hidden + out_pad)          # exp + approx rcp per element
    bytes_accessed = (x_bf.size * 2 + w1.size * 2 + w2.size * 2 + w3.size * 2
                      + b1.size * 4 + b2.size * 4 + b3.size * 4
                      + B * out_pad * 4)
    cost = pl.CostEstimate(flops=flops,
                           transcendentals=transcendentals,
                           bytes_accessed=bytes_accessed)

    out_padded = pl.pallas_call(
        _discriminator_kernel,
        out_shape=jax.ShapeDtypeStruct((B, out_pad), jnp.float32),
        grid_spec=pltpu.PrefetchScalarGridSpec(
            num_scalar_prefetch=0,
            grid=grid,
            in_specs=[x_spec, w1_spec, b1_spec, w2_spec, b2_spec,
                      w3_spec, b3_spec],
            out_specs=out_spec,
        ),
        compiler_params=pltpu.CompilerParams(
            dimension_semantics=("parallel",)),
        cost_estimate=cost,
    )(x_bf, w1, b1, w2, b2, w3, b3)

    return out_padded[:, :out_size]


def init_discriminator_params(key, input_size, hidden_size, output_size):
    """PyTorch nn.Linear default init: U(-1/sqrt(fan_in), 1/sqrt(fan_in)).

    NOTE: weights are stored [in, out] (transposed vs PyTorch's [out, in]).
    """
    ks = jax.random.split(key, 6)

    def linear(kw, kb, fan_in, fan_out):
        bound = 1.0 / jnp.sqrt(fan_in)
        w = jax.random.uniform(kw, (fan_in, fan_out), jnp.float32,
                               -bound, bound)
        b = jax.random.uniform(kb, (1, fan_out), jnp.float32, -bound, bound)
        return w, b

    w1, b1 = linear(ks[0], ks[1], input_size, hidden_size)
    w2, b2 = linear(ks[2], ks[3], hidden_size, hidden_size)
    w3, b3 = linear(ks[4], ks[5], hidden_size, output_size)
    return {"w1": w1, "b1": b1, "w2": w2, "b2": b2, "w3": w3, "b3": b3}


def discriminator_reference(x, p):
    """Pure-JAX f32 reference (exact sigmoid, f32 matmuls)."""
    h = jax.nn.sigmoid(x @ p["w1"] + p["b1"])
    h = jax.nn.sigmoid(h @ p["w2"] + p["b2"])
    return jax.nn.sigmoid(h @ p["w3"] + p["b3"])


if __name__ == "__main__":
    key = jax.random.PRNGKey(0)
    k_param, k_x = jax.random.split(key)

    # Small shapes consistent with the module's forward (batch kept modest but
    # large enough to exercise the wide batch tile).
    batch, input_size, hidden_size, output_size = 256, 16, 32, 8

    params = init_discriminator_params(k_param, input_size, hidden_size,
                                       output_size)
    x = jax.random.normal(k_x, (batch, input_size), jnp.float32)

    out = discriminator_forward(x, params)
    out = jax.block_until_ready(out)

    ref = discriminator_reference(x, params)
    assert out.shape == (batch, output_size)
    # Kernel uses bf16 matmul inputs + approx reciprocal; compare against the
    # exact f32 reference with a tolerance that covers bf16 rounding.
    assert jnp.allclose(out, ref, atol=2e-2, rtol=0.0), float(
        jnp.max(jnp.abs(out - ref)))

    print("KERNEL_OK")
</pallas_src>

<mosaic_0001>
module attributes {stable_mosaic.version = 11 : i64} {
  func.func @_discriminator_kernel(%arg0: i32, %arg1: memref<256x16xbf16, #tpu.memory_space<vmem>>, %arg2: memref<16x32xbf16, #tpu.memory_space<vmem>>, %arg3: memref<1x32xf32, #tpu.memory_space<vmem>>, %arg4: memref<32x32xbf16, #tpu.memory_space<vmem>>, %arg5: memref<1x32xf32, #tpu.memory_space<vmem>>, %arg6: memref<32x128xbf16, #tpu.memory_space<vmem>>, %arg7: memref<1x128xf32, #tpu.memory_space<vmem>>, %arg8: memref<256x128xf32, #tpu.memory_space<vmem>>) attributes {dimension_semantics = [#tpu.dimension_semantics<parallel>], iteration_bounds = array<i64: 1>, scalar_prefetch = 0 : i64, scratch_operands = 0 : i64, tpu.core_type = #tpu.core_type<tc>, window_params = [{transform_indices = @transform_0, window_bounds = array<i64: 256, 16>}, {pipeline_mode = #tpu.pipeline_mode<synchronous>, transform_indices = @transform_1, window_bounds = array<i64: 16, 32>}, {pipeline_mode = #tpu.pipeline_mode<synchronous>, transform_indices = @transform_2, window_bounds = array<i64: 1, 32>}, {pipeline_mode = #tpu.pipeline_mode<synchronous>, transform_indices = @transform_3, window_bounds = array<i64: 32, 32>}, {pipeline_mode = #tpu.pipeline_mode<synchronous>, transform_indices = @transform_4, window_bounds = array<i64: 1, 32>}, {pipeline_mode = #tpu.pipeline_mode<synchronous>, transform_indices = @transform_5, window_bounds = array<i64: 32, 128>}, {pipeline_mode = #tpu.pipeline_mode<synchronous>, transform_indices = @transform_6, window_bounds = array<i64: 1, 128>}, {transform_indices = @transform_7, window_bounds = array<i64: 256, 128>}]} {
    %c0 = arith.constant 0 : index
    %c0_0 = arith.constant 0 : index
    %0 = vector.load %arg1[%c0, %c0_0] : memref<256x16xbf16, #tpu.memory_space<vmem>>, vector<256x16xbf16>
    %c0_1 = arith.constant 0 : index
    %c0_2 = arith.constant 0 : index
    %1 = vector.load %arg2[%c0_1, %c0_2] : memref<16x32xbf16, #tpu.memory_space<vmem>>, vector<16x32xbf16>
    %cst = arith.constant dense<0.000000e+00> : vector<256x32xf32>
    %2 = tpu.matmul %0, %1, %cst {dimension_numbers = #tpu.dot_dimension_numbers<[1], [0], [0], [1], [0, 0, 1, 1], [], []>} : vector<256x16xbf16>, vector<16x32xbf16>, vector<256x32xf32> -> vector<256x32xf32>
    %c0_3 = arith.constant 0 : index
    %c0_4 = arith.constant 0 : index
    %3 = vector.load %arg3[%c0_3, %c0_4] : memref<1x32xf32, #tpu.memory_space<vmem>>, vector<1x32xf32>
    %4 = vector.broadcast %3 : vector<1x32xf32> to vector<256x32xf32>
    %5 = arith.addf %2, %4 : vector<256x32xf32>
    %cst_5 = arith.constant 0.000000e+00 : f32
    %6 = vector.broadcast %cst_5 : f32 to vector<256x32xf32>
    %7 = arith.subf %6, %5 : vector<256x32xf32>
    %8 = math.exp %7 : vector<256x32xf32>
    %cst_6 = arith.constant 1.000000e+00 : f32
    %9 = vector.broadcast %cst_6 : f32 to vector<256x32xf32>
    %10 = arith.addf %9, %8 : vector<256x32xf32>
    %11 = tpu.reciprocal %10 {approx = true} : vector<256x32xf32> -> vector<256x32xf32>
    %12 = arith.truncf %11 : vector<256x32xf32> to vector<256x32xbf16>
    %c0_7 = arith.constant 0 : index
    %c0_8 = arith.constant 0 : index
    %13 = vector.load %arg4[%c0_7, %c0_8] : memref<32x32xbf16, #tpu.memory_space<vmem>>, vector<32x32xbf16>
    %cst_9 = arith.constant dense<0.000000e+00> : vector<256x32xf32>
    %14 = tpu.matmul %12, %13, %cst_9 {dimension_numbers = #tpu.dot_dimension_numbers<[1], [0], [0], [1], [0, 0, 1, 1], [], []>} : vector<256x32xbf16>, vector<32x32xbf16>, vector<256x32xf32> -> vector<256x32xf32>
    %c0_10 = arith.constant 0 : index
    %c0_11 = arith.constant 0 : index
    %15 = vector.load %arg5[%c0_10, %c0_11] : memref<1x32xf32, #tpu.memory_space<vmem>>, vector<1x32xf32>
    %16 = vector.broadcast %15 : vector<1x32xf32> to vector<256x32xf32>
    %17 = arith.addf %14, %16 : vector<256x32xf32>
    %cst_12 = arith.constant 0.000000e+00 : f32
    %18 = vector.broadcast %cst_12 : f32 to vector<256x32xf32>
    %19 = arith.subf %18, %17 : vector<256x32xf32>
    %20 = math.exp %19 : vector<256x32xf32>
    %cst_13 = arith.constant 1.000000e+00 : f32
    %21 = vector.broadcast %cst_13 : f32 to vector<256x32xf32>
    %22 = arith.addf %21, %20 : vector<256x32xf32>
    %23 = tpu.reciprocal %22 {approx = true} : vector<256x32xf32> -> vector<256x32xf32>
    %24 = arith.truncf %23 : vector<256x32xf32> to vector<256x32xbf16>
    %c0_14 = arith.constant 0 : index
    %c0_15 = arith.constant 0 : index
    %25 = vector.load %arg6[%c0_14, %c0_15] : memref<32x128xbf16, #tpu.memory_space<vmem>>, vector<32x128xbf16>
    %cst_16 = arith.constant dense<0.000000e+00> : vector<256x128xf32>
    %26 = tpu.matmul %24, %25, %cst_16 {dimension_numbers = #tpu.dot_dimension_numbers<[1], [0], [0], [1], [0, 0, 1, 1], [], []>} : vector<256x32xbf16>, vector<32x128xbf16>, vector<256x128xf32> -> vector<256x128xf32>
    %c0_17 = arith.constant 0 : index
    %c0_18 = arith.constant 0 : index
    %27 = vector.load %arg7[%c0_17, %c0_18] : memref<1x128xf32, #tpu.memory_space<vmem>>, vector<1x128xf32>
    %28 = vector.broadcast %27 : vector<1x128xf32> to vector<256x128xf32>
    %29 = arith.addf %26, %28 : vector<256x128xf32>
    %cst_19 = arith.constant 0.000000e+00 : f32
    %30 = vector.broadcast %cst_19 : f32 to vector<256x128xf32>
    %31 = arith.subf %30, %29 : vector<256x128xf32>
    %32 = math.exp %31 : vector<256x128xf32>
    %cst_20 = arith.constant 1.000000e+00 : f32
    %33 = vector.broadcast %cst_20 : f32 to vector<256x128xf32>
    %34 = arith.addf %33, %32 : vector<256x128xf32>
    %35 = tpu.reciprocal %34 {approx = true} : vector<256x128xf32> -> vector<256x128xf32>
    %c0_21 = arith.constant 0 : index
    %c0_22 = arith.constant 0 : index
    %36 = vector.load %arg8[%c0_21, %c0_22] : memref<256x128xf32, #tpu.memory_space<vmem>>, vector<256x128xf32>
    tpu.vector_store %arg8[%c0_21, %c0_22], %35 {strides = array<i32>} : memref<256x128xf32, #tpu.memory_space<vmem>>, vector<256x128xf32>,
    return
  }
  func.func @transform_0(%arg0: i32) -> (i32, i32) {
    %c0_i32 = arith.constant 0 : i32
    %c0_i32_0 = arith.constant 0 : i32
    return %arg0, %c0_i32 : i32, i32
  }
  func.func @transform_1(%arg0: i32) -> (i32, i32) {
    %c0_i32 = arith.constant 0 : i32
    %c0_i32_0 = arith.constant 0 : i32
    %c0_i32_1 = arith.constant 0 : i32
    return %c0_i32, %c0_i32_0 : i32, i32
  }
  func.func @transform_2(%arg0: i32) -> (i32, i32) {
    %c0_i32 = arith.constant 0 : i32
    %c0_i32_0 = arith.constant 0 : i32
    %c0_i32_1 = arith.constant 0 : i32
    return %c0_i32, %c0_i32_0 : i32, i32
  }
  func.func @transform_3(%arg0: i32) -> (i32, i32) {
    %c0_i32 = arith.constant 0 : i32
    %c0_i32_0 = arith.constant 0 : i32
    %c0_i32_1 = arith.constant 0 : i32
    return %c0_i32, %c0_i32_0 : i32, i32
  }
  func.func @transform_4(%arg0: i32) -> (i32, i32) {
    %c0_i32 = arith.constant 0 : i32
    %c0_i32_0 = arith.constant 0 : i32
    %c0_i32_1 = arith.constant 0 : i32
    return %c0_i32, %c0_i32_0 : i32, i32
  }
  func.func @transform_5(%arg0: i32) -> (i32, i32) {
    %c0_i32 = arith.constant 0 : i32
    %c0_i32_0 = arith.constant 0 : i32
    %c0_i32_1 = arith.constant 0 : i32
    return %c0_i32, %c0_i32_0 : i32, i32
  }
  func.func @transform_6(%arg0: i32) -> (i32, i32) {
    %c0_i32 = arith.constant 0 : i32
    %c0_i32_0 = arith.constant 0 : i32
    %c0_i32_1 = arith.constant 0 : i32
    return %c0_i32, %c0_i32_0 : i32, i32
  }
  func.func @transform_7(%arg0: i32) -> (i32, i32) {
    %c0_i32 = arith.constant 0 : i32
    %c0_i32_0 = arith.constant 0 : i32
    return %arg0, %c0_i32 : i32, i32
  }
}

</mosaic_0001>

<bundles_post_ra>
// kernel: discriminator_forward.1
= control target key start
LH: loop header
LB: loop body
LE: loop exit
PB: predicated region body
PF: predicated region fallthrough
CT: control target
= control target key end

     0   :  { %vm151_vm0 = vcmask 130048   ;;  %vm485_vm1 = vcmask 261120   ;;  %s2057_s1 = inlined_call_operand.vmem [shape: bf16[16,32], index: 1, kind: input, shape index: {}]   ;;  %s2058_s0 = inlined_call_operand.vmem [shape: bf16[256,16], index: 0, kind: input, shape index: {}]   ;;  %s2059_s2 = inlined_call_operand.vmem [shape: f32[1,32], index: 2, kind: input, shape index: {}]   ;;  %s2060_s3 = inlined_call_operand.vmem [shape: bf16[32,32], index: 3, kind: input, shape index: {}]   ;;  %s2061_s4 = inlined_call_operand.vmem [shape: f32[1,32], index: 4, kind: input, shape index: {}]   ;;  %s2062_s5 = inlined_call_operand.vmem [shape: bf16[32,128], index: 5, kind: input, shape index: {}]   ;;  %s2063_s6 = inlined_call_operand.vmem [shape: f32[1,128], index: 6, kind: input, shape index: {}]   ;;  %s2064_s7 = inlined_call_operand.vmem [shape: f32[256,128], index: 7, kind: output, shape index: {}]  }
   0x1   :  { %v1300_v0 = vld [vmem:[%s2057_s1] sm:$0xff]  ;;  %v1285_v2 = vld [vmem:[%s2058_s0 + $0x8] sm:$0xff]  ;;  %v1286_v3 = vld [vmem:[%s2058_s0 + $0x10] sm:$0xff] }
   0x2   :  { %v1284_v1 = vld [vmem:[%s2058_s0] sm:$0xff]  ;;  %207 = vmatpush.bf16.msra.mxu0 %v1300_v0  ;;  %1305 = vmatpush.bf16.msra.mxu3 %v1300_v0  ;;  %v1287_v4 = vld [vmem:[%s2058_s0 + $0x18] sm:$0xff]  ;;  %v1289_v6 = vld [vmem:[%s2058_s0 + $0x28] sm:$0xff] }
   0x3   :  { %v1288_v5 = vld [vmem:[%s2058_s0 + $0x20] sm:$0xff]  ;;  %v1290_v7 = vld [vmem:[%s2058_s0 + $0x30] sm:$0xff]  ;;  %v1291_v8 = vld [vmem:[%s2058_s0 + $0x38] sm:$0xff] }
   0x4   :  { %v1302_v9 = vld [vmem:[%s2060_s3 + $0x8] sm:$0xff]  ;;  %v1301_v10 = vld [vmem:[%s2060_s3] sm:$0xff]  ;;  %v1294_v37 = vld [vmem:[%s2058_s0 + $0x50] sm:$0xff] }
   0x5   :  { %1220 = vmatmul.msk.bf16.vlgmr.msra.gmra.mxu0 %vm151_vm0, %v1284_v1  ;;  %540 = vmatpush.bf16.msra.mxu1 %v1302_v9  ;;  %v1782_v11 = vld [vmem:[%s2059_s2] ss:$0 sm:$0xff]  ;;  %v1293_v21 = vld [vmem:[%s2058_s0 + $0x48] sm:$0xff]  ;;  %v1295_v54 = vld [vmem:[%s2058_s0 + $0x58] sm:$0xff] }
   0x6   :  { %1306 = vmatpush.bf16.msrb.mxu3 %v1302_v9  ;;  %v1292_v12 = vld [vmem:[%s2058_s0 + $0x40] sm:$0xff]  ;;  %v1297_v43 = vld [vmem:[%s2058_s0 + $0x68] sm:$0xff]  ;;  %v1298_v60 = vld [vmem:[%s2058_s0 + $0x70] sm:$0xff] }
   0x7   :  { %1233 = vmatmul.msk.bf16.vlgmr.msra.gmra.mxu3 %vm151_vm0, %v1297_v43 }
   0x9   :  { %541 = vmatpush.bf16.msra.mxu1 %v1301_v10 }
   0xa   :  { %1307 = vmatpush.bf16.msrb.mxu3 %v1301_v10 }
  0x15   :  { %1221 = vmatmul.msk.bf16.gmra.mxu0 %vm151_vm0, %v1285_v2 }
  0x17   :  { %1234 = vmatmul.msk.bf16.gmra.mxu3 %vm151_vm0, %v1298_v60 }
  0x25   :  { %1222 = vmatmul.msk.bf16.gmra.mxu0 %vm151_vm0, %v1286_v3 }
  0x35   :  { %1223 = vmatmul.msk.bf16.gmra.mxu0 %vm151_vm0, %v1287_v4 }
  0x45   :  { %1224 = vmatmul.msk.bf16.gmra.mxu0 %vm151_vm0, %v1288_v5 }
  0x55   :  { %1225 = vmatmul.msk.bf16.gmra.mxu0 %vm151_vm0, %v1289_v6 }
  0x65   :  { %1226 = vmatmul.msk.bf16.gmra.mxu0 %vm151_vm0, %v1290_v7  ;;  %v1296_v7 = vld [vmem:[%s2058_s0 + $0x60] sm:$0xff] }
  0x75   :  { %1227 = vmatmul.msk.bf16.gmra.mxu0 %vm151_vm0, %v1291_v8 }
  0x82   :  { %v209_v13 = vpop.f32.mrf.mxu0 }
  0x83   :  { %v210_v14 = vadd.f32 %v1782_v11, %v209_v13 }
  0x85   :  { %v289_v15 = vsub.f32 0.0, %v210_v14  ;;  %1228 = vmatmul.msk.bf16.gmra.mxu0 %vm151_vm0, %v1292_v12  ;;  %v1299_v14 = vld [vmem:[%s2058_s0 + $0x78] sm:$0xff] }
  0x86   :  { %1235 = vmatmul.msk.bf16.gmra.mxu3 %vm151_vm0, %v1299_v14 }
  0x87   :  { %v321_v16 = vmul.f32 1.442695, %v289_v15 }
  0x89   :  { %1313 = vpow2.f32 %v321_v16 }
  0x8a   :  { %v211_v17 = vpop.f32.mrf.mxu0 }
  0x8b   :  { %v212_v18 = vadd.f32 %v1782_v11, %v211_v17 }
  0x8d   :  { %v290_v19 = vsub.f32 0.0, %v212_v18 }
  0x8f   :  { %v323_v20 = vmul.f32 1.442695, %v290_v19  ;;  %v1314_v22 = vpop.eup %1313 }
  0x90   :  { %v385_v25 = vadd.f32 1.0, %v1314_v22 }
  0x91   :  { %1315 = vpow2.f32 %v323_v20 }
  0x92   :  { %v214_v23 = vpop.f32.mrf.mxu0  ;;  %1317 = vrcp.f32 %v385_v25 }
  0x93   :  { %v215_v24 = vadd.f32 %v1782_v11, %v214_v23 }
  0x95   :  { %v291_v26 = vsub.f32 0.0, %v215_v24  ;;  %1229 = vmatmul.msk.bf16.gmra.mxu0 %vm151_vm0, %v1293_v21 }
  0x97   :  { %v1316_v27 = vpop.eup %1315  ;;  %v325_v29 = vmul.f32 1.442695, %v291_v26 }
  0x98   :  { %v386_v28 = vadd.f32 1.0, %v1316_v27  ;;  %v1318_v33 = vpop.eup %1317 }
  0x9a   :  { %1319 = vrcp.f32 %v386_v28  ;;  %v216_v30 = vpop.f32.mrf.mxu0 }
  0x9b   :  { %v217_v31 = vadd.f32 %v1782_v11, %v216_v30  ;;  %1321 = vpow2.f32 %v325_v29 }
  0x9d   :  { %v292_v32 = vsub.f32 0.0, %v217_v31 }
  0x9f   :  { %v327_v34 = vmul.f32 1.442695, %v292_v32 }
  0xa0   :  { %v1320_v35 = vpop.eup %1319 }
  0xa1   :  { %1323 = vpow2.f32 %v327_v34  ;;  %v449_v36 = vpack.c.bf16 %v1320_v35, %v1318_v33  ;;  %v1322_v38 = vpop.eup %1321 }
  0xa2   :  { %v219_v39 = vpop.f32.mrf.mxu0  ;;  %v387_v41 = vadd.f32 1.0, %v1322_v38 }
  0xa3   :  { %v220_v40 = vadd.f32 %v1782_v11, %v219_v39  ;;  %1244 = vmatmul.msk.bf16.vlgmr.msra.gmra.mxu1 %vm485_vm1, %v449_v36 }
  0xa4   :  { %1325 = vrcp.f32 %v387_v41 }
  0xa5   :  { %v293_v42 = vsub.f32 0.0, %v220_v40  ;;  %1230 = vmatmul.msk.bf16.gmra.mxu0 %vm151_vm0, %v1294_v37 }
  0xa7   :  { %v1324_v44 = vpop.eup %1323  ;;  %v329_v46 = vmul.f32 1.442695, %v293_v42 }
  0xa8   :  { %v388_v45 = vadd.f32 1.0, %v1324_v44 }
  0xaa   :  { %1327 = vrcp.f32 %v388_v45  ;;  %v221_v47 = vpop.f32.mrf.mxu0  ;;  %v1326_v50 = vpop.eup %1325 }
  0xab   :  { %v222_v48 = vadd.f32 %v1782_v11, %v221_v47  ;;  %1329 = vpow2.f32 %v329_v46 }
  0xad   :  { %v294_v49 = vsub.f32 0.0, %v222_v48 }
  0xaf   :  { %v331_v51 = vmul.f32 1.442695, %v294_v49 }
  0xb0   :  { %v1328_v52 = vpop.eup %1327 }
  0xb1   :  { %1331 = vpow2.f32 %v331_v51  ;;  %v450_v53 = vpack.c.bf16 %v1328_v52, %v1326_v50  ;;  %v1330_v55 = vpop.eup %1329 }
  0xb2   :  { %v224_v56 = vpop.f32.mrf.mxu0  ;;  %v389_v58 = vadd.f32 1.0, %v1330_v55 }
  0xb3   :  { %v225_v57 = vadd.f32 %v1782_v11, %v224_v56  ;;  %1245 = vmatmul.msk.bf16.gmra.mxu1 %vm485_vm1, %v450_v53 }
  0xb4   :  { %1333 = vrcp.f32 %v389_v58 }
  0xb5   :  { %v295_v59 = vsub.f32 0.0, %v225_v57  ;;  %1231 = vmatmul.msk.bf16.gmra.mxu0 %vm151_vm0, %v1295_v54 }
  0xb7   :  { %v1332_v61 = vpop.eup %1331  ;;  %v333_v63 = vmul.f32 1.442695, %v295_v59 }
  0xb8   :  { %v390_v62 = vadd.f32 1.0, %v1332_v61 }
  0xba   :  { %1335 = vrcp.f32 %v390_v62  ;;  %v226_v0 = vpop.f32.mrf.mxu0  ;;  %v1334_v3 = vpop.eup %1333 }
  0xbb   :  { %v227_v1 = vadd.f32 %v1782_v11, %v226_v0  ;;  %1337 = vpow2.f32 %v333_v63 }
  0xbd   :  { %v296_v2 = vsub.f32 0.0, %v227_v1 }
  0xbf   :  { %v335_v4 = vmul.f32 1.442695, %v296_v2 }
  0xc0   :  { %v1336_v5 = vpop.eup %1335 }
  0xc1   :  { %1339 = vpow2.f32 %v335_v4  ;;  %v451_v6 = vpack.c.bf16 %v1336_v5, %v1334_v3  ;;  %v1338_v8 = vpop.eup %1337 }
  0xc2   :  { %v229_v9 = vpop.f32.mrf.mxu0  ;;  %v391_v12 = vadd.f32 1.0, %v1338_v8 }
  0xc3   :  { %v230_v10 = vadd.f32 %v1782_v11, %v229_v9  ;;  %1246 = vmatmul.msk.bf16.gmra.mxu1 %vm485_vm1, %v451_v6 }
  0xc4   :  { %1341 = vrcp.f32 %v391_v12 }
  0xc5   :  { %v297_v13 = vsub.f32 0.0, %v230_v10  ;;  %1232 = vmatmul.msk.bf16.gmra.mxu0 %vm151_vm0, %v1296_v7 }
  0xc7   :  { %v1340_v15 = vpop.eup %1339  ;;  %v337_v17 = vmul.f32 1.442695, %v297_v13 }
  0xc8   :  { %v392_v16 = vadd.f32 1.0, %v1340_v15 }
  0xca   :  { %1343 = vrcp.f32 %v392_v16  ;;  %v231_v18 = vpop.f32.mrf.mxu0  ;;  %v1342_v21 = vpop.eup %1341 }
  0xcb   :  { %v232_v19 = vadd.f32 %v1782_v11, %v231_v18  ;;  %1345 = vpow2.f32 %v337_v17 }
  0xcd   :  { %v298_v20 = vsub.f32 0.0, %v232_v19 }
  0xcf   :  { %v339_v22 = vmul.f32 1.442695, %v298_v20 }
  0xd0   :  { %v1344_v23 = vpop.eup %1343 }
  0xd1   :  { %1347 = vpow2.f32 %v339_v22  ;;  %v452_v24 = vpack.c.bf16 %v1344_v23, %v1342_v21  ;;  %v1346_v25 = vpop.eup %1345 }
  0xd2   :  { %v234_v26 = vpop.f32.mrf.mxu0  ;;  %v393_v28 = vadd.f32 1.0, %v1346_v25 }
  0xd3   :  { %v235_v27 = vadd.f32 %v1782_v11, %v234_v26  ;;  %1247 = vmatmul.msk.bf16.gmra.mxu1 %vm485_vm1, %v452_v24 }
  0xd4   :  { %1349 = vrcp.f32 %v393_v28 }
  0xd5   :  { %v299_v29 = vsub.f32 0.0, %v235_v27 }
  0xd7   :  { %v1348_v30 = vpop.eup %1347  ;;  %v341_v32 = vmul.f32 1.442695, %v299_v29 }
  0xd8   :  { %v394_v31 = vadd.f32 1.0, %v1348_v30  ;;  %v1304_v30 = vld [vmem:[%s2062_s5 + $0x8] sm:$0xff] }
  0xd9   :  { %873 = vmatpush.bf16.msra.mxu2 %v1304_v30  ;;  %1308 = vmatpush.bf16.msra.mxu3 %v1304_v30 }
  0xda   :  { %1351 = vrcp.f32 %v394_v31  ;;  %v236_v33 = vpop.f32.mrf.mxu0  ;;  %v1350_v36 = vpop.eup %1349 }
  0xdb   :  { %v237_v34 = vadd.f32 %v1782_v11, %v236_v33  ;;  %1353 = vpow2.f32 %v341_v32  ;;  %v1303_v33 = vld [vmem:[%s2062_s5] sm:$0xff] }
  0xdd   :  { %v300_v35 = vsub.f32 0.0, %v237_v34  ;;  %874 = vmatpush.bf16.msra.mxu2 %v1303_v33  ;;  %1309 = vmatpush.bf16.msra.mxu3 %v1303_v33 }
  0xdf   :  { %v343_v37 = vmul.f32 1.442695, %v300_v35  ;;  %v1853_v35 = vld [vmem:[%s2061_s4] ss:$0 sm:$0xff] }
  0xe0   :  { %v1352_v38 = vpop.eup %1351 }
  0xe1   :  { %1355 = vpow2.f32 %v343_v37  ;;  %v453_v39 = vpack.c.bf16 %v1352_v38, %v1350_v36  ;;  %v1354_v40 = vpop.eup %1353 }
  0xe2   :  { %v239_v41 = vpop.f32.mrf.mxu0  ;;  %v395_v43 = vadd.f32 1.0, %v1354_v40 }
  0xe3   :  { %v240_v42 = vadd.f32 %v1782_v11, %v239_v41  ;;  %1248 = vmatmul.msk.bf16.gmra.mxu1 %vm485_vm1, %v453_v39 }
  0xe4   :  { %1357 = vrcp.f32 %v395_v43 }
  0xe5   :  { %v301_v44 = vsub.f32 0.0, %v240_v42 }
  0xe7   :  { %v1356_v45 = vpop.eup %1355  ;;  %v345_v47 = vmul.f32 1.442695, %v301_v44 }
  0xe8   :  { %v396_v46 = vadd.f32 1.0, %v1356_v45 }
  0xea   :  { %1359 = vrcp.f32 %v396_v46  ;;  %v241_v48 = vpop.f32.mrf.mxu0  ;;  %v1358_v51 = vpop.eup %1357 }
  0xeb   :  { %v242_v49 = vadd.f32 %v1782_v11, %v241_v48  ;;  %1361 = vpow2.f32 %v345_v47 }
  0xed   :  { %v302_v50 = vsub.f32 0.0, %v242_v49 }
  0xef   :  { %v347_v52 = vmul.f32 1.442695, %v302_v50 }
  0xf0   :  { %v1360_v53 = vpop.eup %1359 }
  0xf1   :  { %1363 = vpow2.f32 %v347_v52  ;;  %v454_v54 = vpack.c.bf16 %v1360_v53, %v1358_v51  ;;  %v1362_v55 = vpop.eup %1361 }
  0xf2   :  { %v244_v56 = vpop.f32.mrf.mxu0  ;;  %v397_v58 = vadd.f32 1.0, %v1362_v55 }
  0xf3   :  { %v245_v57 = vadd.f32 %v1782_v11, %v244_v56  ;;  %1249 = vmatmul.msk.bf16.gmra.mxu1 %vm485_vm1, %v454_v54 }
  0xf4   :  { %1365 = vrcp.f32 %v397_v58 }
  0xf5   :  { %v303_v59 = vsub.f32 0.0, %v245_v57 }
  0xf7   :  { %v1364_v60 = vpop.eup %1363  ;;  %v349_v62 = vmul.f32 1.442695, %v303_v59 }
  0xf8   :  { %v398_v61 = vadd.f32 1.0, %v1364_v60 }
  0xfa   :  { %1367 = vrcp.f32 %v398_v61  ;;  %v246_v63 = vpop.f32.mrf.mxu0  ;;  %v1366_v2 = vpop.eup %1365 }
  0xfb   :  { %v247_v0 = vadd.f32 %v1782_v11, %v246_v63  ;;  %1369 = vpow2.f32 %v349_v62 }
  0xfd   :  { %v304_v1 = vsub.f32 0.0, %v247_v0 }
  0xff   :  { %v351_v3 = vmul.f32 1.442695, %v304_v1 }
 0x100   :  { %v1368_v4 = vpop.eup %1367 }
 0x101   :  { %1371 = vpow2.f32 %v351_v3  ;;  %v455_v5 = vpack.c.bf16 %v1368_v4, %v1366_v2  ;;  %v1370_v6 = vpop.eup %1369 }
 0x102   :  { %v249_v7 = vpop.f32.mrf.mxu0  ;;  %v399_v9 = vadd.f32 1.0, %v1370_v6 }
 0x103   :  { %v250_v8 = vadd.f32 %v1782_v11, %v249_v7  ;;  %1250 = vmatmul.msk.bf16.gmra.mxu1 %vm485_vm1, %v455_v5 }
 0x104   :  { %1373 = vrcp.f32 %v399_v9 }
 0x105   :  { %v305_v10 = vsub.f32 0.0, %v250_v8 }
 0x107   :  { %v1372_v12 = vpop.eup %1371  ;;  %v353_v13 = vmul.f32 1.442695, %v305_v10 }
 0x108   :  { %v400_v14 = vadd.f32 1.0, %v1372_v12 }
 0x10a   :  { %1375 = vrcp.f32 %v400_v14  ;;  %v251_v15 = vpop.f32.mrf.mxu0  ;;  %v1374_v18 = vpop.eup %1373 }
 0x10b   :  { %1377 = vpow2.f32 %v353_v13  ;;  %v252_v16 = vadd.f32 %v1782_v11, %v251_v15 }
 0x10d   :  { %v306_v17 = vsub.f32 0.0, %v252_v16 }
 0x10f   :  { %v355_v19 = vmul.f32 1.442695, %v306_v17  ;;  %v274_v17 = vpop.f32.mrf.mxu3 }
 0x110   :  { %v1376_v20 = vpop.eup %1375 }
 0x111   :  { %v1378_v21 = vpop.eup %1377  ;;  %1379 = vpow2.f32 %v355_v19  ;;  %v456_v22 = vpack.c.bf16 %v1376_v20, %v1374_v18 }
 0x112   :  { %v254_v23 = vpop.f32.mrf.mxu0  ;;  %v401_v25 = vadd.f32 1.0, %v1378_v21 }
 0x113   :  { %v255_v24 = vadd.f32 %v1782_v11, %v254_v23  ;;  %1251 = vmatmul.msk.bf16.gmra.mxu1 %vm485_vm1, %v456_v22 }
 0x114   :  { %1381 = vrcp.f32 %v401_v25 }
 0x115   :  { %v307_v26 = vsub.f32 0.0, %v255_v24 }
 0x117   :  { %v1380_v27 = vpop.eup %1379  ;;  %v357_v28 = vmul.f32 1.442695, %v307_v26 }
 0x118   :  { %v402_v29 = vadd.f32 1.0, %v1380_v27 }
 0x119   :  { %1383 = vpow2.f32 %v357_v28 }
 0x11a   :  { %1385 = vrcp.f32 %v402_v29  ;;  %v256_v31 = vpop.f32.mrf.mxu0  ;;  %v1382_v36 = vpop.eup %1381 }
 0x11b   :  { %v257_v32 = vadd.f32 %v1782_v11, %v256_v31 }
 0x11d   :  { %v308_v34 = vsub.f32 0.0, %v257_v32 }
 0x11f   :  { %v1384_v37 = vpop.eup %1383  ;;  %v359_v38 = vmul.f32 1.442695, %v308_v34 }
 0x120   :  { %v1386_v39 = vpop.eup %1385  ;;  %v543_v40 = vpop.f32.mrf.mxu1  ;;  %v403_v44 = vadd.f32 1.0, %v1384_v37 }
 0x121   :  { %1387 = vpow2.f32 %v359_v38  ;;  %v544_v41 = vadd.f32 %v1853_v35, %v543_v40  ;;  %v457_v42 = vpack.c.bf16 %v1386_v39, %v1382_v36  ;;  %v276_v39 = vpop.f32.mrf.mxu3 }
 0x122   :  { %v259_v43 = vpop.f32.mrf.mxu0  ;;  %1389 = vrcp.f32 %v403_v44 }
 0x123   :  { %v623_v45 = vsub.f32 0.0, %v544_v41  ;;  %v260_v46 = vadd.f32 %v1782_v11, %v259_v43  ;;  %1252 = vmatmul.msk.bf16.gmra.mxu1 %vm485_vm1, %v457_v42 }
 0x125   :  { %v655_v47 = vmul.f32 1.442695, %v623_v45  ;;  %v309_v48 = vsub.f32 0.0, %v260_v46 }
 0x127   :  { %v1388_v49 = vpop.eup %1387  ;;  %v361_v50 = vmul.f32 1.442695, %v309_v48  ;;  %1391 = vpow2.f32 %v655_v47 }
 0x128   :  { %v404_v51 = vadd.f32 1.0, %v1388_v49  ;;  %v545_v52 = vpop.f32.mrf.mxu1  ;;  %v1390_v57 = vpop.eup %1389 }
 0x129   :  { %1393 = vpow2.f32 %v361_v50  ;;  %v546_v53 = vadd.f32 %v1853_v35, %v545_v52  ;;  %v275_v50 = vadd.f32 %v1782_v11, %v274_v17  ;;  %v277_v52 = vadd.f32 %v1782_v11, %v276_v39 }
 0x12a   :  { %1395 = vrcp.f32 %v404_v51  ;;  %v261_v54 = vpop.f32.mrf.mxu0 }
 0x12b   :  { %v624_v55 = vsub.f32 0.0, %v546_v53  ;;  %v262_v56 = vadd.f32 %v1782_v11, %v261_v54 }
 0x12d   :  { %v657_v58 = vmul.f32 1.442695, %v624_v55  ;;  %v310_v59 = vsub.f32 0.0, %v262_v56  ;;  %v1392_v60 = vpop.eup %1391 }
 0x12e   :  { %v719_v1 = vadd.f32 1.0, %v1392_v60 }
 0x12f   :  { %v1394_v61 = vpop.eup %1393  ;;  %1397 = vpow2.f32 %v657_v58  ;;  %v363_v62 = vmul.f32 1.442695, %v310_v59  ;;  %v315_v58 = vsub.f32 0.0, %v275_v50  ;;  %v279_v59 = vpop.f32.mrf.mxu3 }
 0x130   :  { %v1396_v63 = vpop.eup %1395  ;;  %v548_v0 = vpop.f32.mrf.mxu1  ;;  %v405_v4 = vadd.f32 1.0, %v1394_v61 }
 0x131   :  { %1399 = vpow2.f32 %v363_v62  ;;  %v549_v2 = vadd.f32 %v1853_v35, %v548_v0  ;;  %v458_v3 = vpack.c.bf16 %v1396_v63, %v1390_v57  ;;  %v316_v63 = vsub.f32 0.0, %v277_v52 }
 0x132   :  { %v264_v5 = vpop.f32.mrf.mxu0  ;;  %1401 = vrcp.f32 %v719_v1 }
 0x133   :  { %v625_v6 = vsub.f32 0.0, %v549_v2  ;;  %v265_v7 = vadd.f32 %v1782_v11, %v264_v5  ;;  %1253 = vmatmul.msk.bf16.gmra.mxu1 %vm485_vm1, %v458_v3  ;;  %1403 = vrcp.f32 %v405_v4  ;;  %v373_v5 = vmul.f32 1.442695, %v315_v58 }
 0x135   :  { %v1398_v8 = vpop.eup %1397  ;;  %v659_v9 = vmul.f32 1.442695, %v625_v6  ;;  %v311_v10 = vsub.f32 0.0, %v265_v7 }
 0x136   :  { %v720_v12 = vadd.f32 1.0, %v1398_v8  ;;  %v375_v8 = vmul.f32 1.442695, %v316_v63 }
 0x137   :  { %v1400_v13 = vpop.eup %1399  ;;  %1405 = vpow2.f32 %v659_v9  ;;  %v365_v14 = vmul.f32 1.442695, %v311_v10  ;;  %v281_v17 = vpop.f32.mrf.mxu3 }
 0x138   :  { %1407 = vrcp.f32 %v720_v12  ;;  %v406_v15 = vadd.f32 1.0, %v1400_v13  ;;  %v550_v16 = vpop.f32.mrf.mxu1  ;;  %v1402_v20 = vpop.eup %1401 }
 0x139   :  { %1409 = vpow2.f32 %v365_v14  ;;  %v551_v18 = vadd.f32 %v1853_v35, %v550_v16  ;;  %v1404_v23 = vpop.eup %1403 }
 0x13a   :  { %1411 = vrcp.f32 %v406_v15  ;;  %v266_v19 = vpop.f32.mrf.mxu0 }
 0x13b   :  { %v626_v21 = vsub.f32 0.0, %v551_v18  ;;  %v267_v22 = vadd.f32 %v1782_v11, %v266_v19 }
 0x13d   :  { %v1406_v24 = vpop.eup %1405  ;;  %v661_v25 = vmul.f32 1.442695, %v626_v21  ;;  %v312_v26 = vsub.f32 0.0, %v267_v22  ;;  %v280_v22 = vadd.f32 %v1782_v11, %v279_v59 }
 0x13e   :  { %v1408_v27 = vpop.eup %1407  ;;  %v721_v33 = vadd.f32 1.0, %v1406_v24  ;;  %v282_v24 = vadd.f32 %v1782_v11, %v281_v17 }
 0x13f   :  { %v1410_v28 = vpop.eup %1409  ;;  %1413 = vpow2.f32 %v661_v25  ;;  %v367_v29 = vmul.f32 1.442695, %v312_v26  ;;  %v783_v30 = vpack.c.bf16 %v1408_v27, %v1402_v20 }
 0x140   :  { %v1412_v31 = vpop.eup %1411  ;;  %v553_v32 = vpop.f32.mrf.mxu1  ;;  %v407_v37 = vadd.f32 1.0, %v1410_v28 }
 0x141   :  { %1415 = vpow2.f32 %v367_v29  ;;  %v554_v34 = vadd.f32 %v1853_v35, %v553_v32  ;;  %1268 = vmatmul.msk.bf16.vlgmr.msra.gmra.mxu2 %vm485_vm1, %v783_v30  ;;  %v459_v36 = vpack.c.bf16 %v1412_v31, %v1404_v23  ;;  %v317_v30 = vsub.f32 0.0, %v280_v22 }
 0x142   :  { %v269_v38 = vpop.f32.mrf.mxu0  ;;  %1417 = vrcp.f32 %v721_v33  ;;  %v318_v32 = vsub.f32 0.0, %v282_v24 }
 0x143   :  { %v627_v40 = vsub.f32 0.0, %v554_v34  ;;  %v270_v41 = vadd.f32 %v1782_v11, %v269_v38  ;;  %1254 = vmatmul.msk.bf16.gmra.mxu1 %vm485_vm1, %v459_v36  ;;  %1419 = vrcp.f32 %v407_v37 }
 0x145   :  { %v1414_v42 = vpop.eup %1413  ;;  %v663_v43 = vmul.f32 1.442695, %v627_v40  ;;  %v313_v44 = vsub.f32 0.0, %v270_v41  ;;  %v284_v40 = vpop.f32.mrf.mxu3  ;;  %v377_v41 = vmul.f32 1.442695, %v317_v30 }
 0x146   :  { %v722_v45 = vadd.f32 1.0, %v1414_v42 }
 0x147   :  { %v1416_v46 = vpop.eup %1415  ;;  %1421 = vpow2.f32 %v663_v43  ;;  %v369_v47 = vmul.f32 1.442695, %v313_v44  ;;  %v379_v44 = vmul.f32 1.442695, %v318_v32 }
 0x148   :  { %1423 = vrcp.f32 %v722_v45  ;;  %v408_v48 = vadd.f32 1.0, %v1416_v46  ;;  %v555_v49 = vpop.f32.mrf.mxu1  ;;  %v1418_v54 = vpop.eup %1417 }
 0x149   :  { %1425 = vpow2.f32 %v369_v47  ;;  %v556_v51 = vadd.f32 %v1853_v35, %v555_v49  ;;  %v1420_v57 = vpop.eup %1419 }
 0x14a   :  { %1427 = vrcp.f32 %v408_v48  ;;  %v271_v53 = vpop.f32.mrf.mxu0 }
 0x14b   :  { %v628_v55 = vsub.f32 0.0, %v556_v51  ;;  %v272_v56 = vadd.f32 %v1782_v11, %v271_v53 }
 0x14d   :  { %v1422_v60 = vpop.eup %1421  ;;  %v665_v61 = vmul.f32 1.442695, %v628_v55  ;;  %v314_v62 = vsub.f32 0.0, %v272_v56  ;;  %v286_v55 = vpop.f32.mrf.mxu3 }
 0x14e   :  { %v1424_v0 = vpop.eup %1423  ;;  %v723_v10 = vadd.f32 1.0, %v1422_v60 }
 0x14f   :  { %v1426_v1 = vpop.eup %1425  ;;  %1429 = vpow2.f32 %v665_v61  ;;  %v371_v2 = vmul.f32 1.442695, %v314_v62  ;;  %v784_v3 = vpack.c.bf16 %v1424_v0, %v1418_v54  ;;  %v285_v54 = vadd.f32 %v1782_v11, %v284_v40 }
 0x150   :  { %v1428_v4 = vpop.eup %1427  ;;  %v558_v6 = vpop.f32.mrf.mxu1  ;;  %v409_v12 = vadd.f32 1.0, %v1426_v1  ;;  %v287_v61 = vadd.f32 %v1782_v11, %v286_v55 }
 0x151   :  { %1431 = vpow2.f32 %v371_v2  ;;  %v559_v7 = vadd.f32 %v1853_v35, %v558_v6  ;;  %1269 = vmatmul.msk.bf16.gmra.mxu2 %vm485_vm1, %v784_v3  ;;  %v460_v9 = vpack.c.bf16 %v1428_v4, %v1420_v57  ;;  %v319_v63 = vsub.f32 0.0, %v285_v54 }
 0x152   :  { %1433 = vpow2.f32 %v373_v5  ;;  %v320_v6 = vsub.f32 0.0, %v287_v61 }
 0x153   :  { %v629_v13 = vsub.f32 0.0, %v559_v7  ;;  %1255 = vmatmul.msk.bf16.gmra.mxu1 %vm485_vm1, %v460_v9  ;;  %1435 = vpow2.f32 %v375_v8  ;;  %v381_v8 = vmul.f32 1.442695, %v319_v63 }
 0x154   :  { %1437 = vrcp.f32 %v723_v10 }
 0x155   :  { %v1430_v14 = vpop.eup %1429  ;;  %v667_v15 = vmul.f32 1.442695, %v629_v13  ;;  %1439 = vrcp.f32 %v409_v12  ;;  %v383_v12 = vmul.f32 1.442695, %v320_v6 }
 0x156   :  { %v724_v16 = vadd.f32 1.0, %v1430_v14 }
 0x157   :  { %v1432_v18 = vpop.eup %1431 }
 0x158   :  { %1441 = vrcp.f32 %v724_v16  ;;  %v410_v19 = vadd.f32 1.0, %v1432_v18  ;;  %v560_v20 = vpop.f32.mrf.mxu1  ;;  %v1434_v23 = vpop.eup %1433 }
 0x159   :  { %1443 = vpow2.f32 %v667_v15  ;;  %v561_v21 = vadd.f32 %v1853_v35, %v560_v20  ;;  %v1436_v25 = vpop.eup %1435  ;;  %v411_v34 = vadd.f32 1.0, %v1434_v23 }
 0x15a   :  { %1445 = vrcp.f32 %v410_v19  ;;  %v1438_v27 = vpop.eup %1437  ;;  %v412_v38 = vadd.f32 1.0, %v1436_v25 }
 0x15b   :  { %v630_v26 = vsub.f32 0.0, %v561_v21  ;;  %v1440_v28 = vpop.eup %1439 }
 0x15d   :  { %v669_v29 = vmul.f32 1.442695, %v630_v26 }
 0x15e   :  { %v1442_v31 = vpop.eup %1441 }
 0x15f   :  { %v1444_v33 = vpop.eup %1443  ;;  %1447 = vpow2.f32 %v669_v29  ;;  %v785_v36 = vpack.c.bf16 %v1442_v31, %v1438_v27 }
 0x160   :  { %v1446_v37 = vpop.eup %1445  ;;  %v563_v39 = vpop.f32.mrf.mxu1  ;;  %1449 = vrcp.f32 %v411_v34  ;;  %v725_v45 = vadd.f32 1.0, %v1444_v33 }
 0x161   :  { %v564_v42 = vadd.f32 %v1853_v35, %v563_v39  ;;  %1270 = vmatmul.msk.bf16.gmra.mxu2 %vm485_vm1, %v785_v36  ;;  %v461_v43 = vpack.c.bf16 %v1446_v37, %v1440_v28  ;;  %1451 = vrcp.f32 %v412_v38 }
 0x162   :  { %1453 = vpow2.f32 %v377_v41 }
 0x163   :  { %v631_v46 = vsub.f32 0.0, %v564_v42  ;;  %1256 = vmatmul.msk.bf16.vlgmr.msrb.gmra.mxu3 %vm485_vm1, %v461_v43  ;;  %1455 = vpow2.f32 %v379_v44 }
 0x164   :  { %1457 = vrcp.f32 %v725_v45 }
 0x165   :  { %v1448_v47 = vpop.eup %1447  ;;  %v671_v49 = vmul.f32 1.442695, %v631_v46 }
 0x166   :  { %v726_v48 = vadd.f32 1.0, %v1448_v47  ;;  %v1450_v51 = vpop.eup %1449 }
 0x167   :  { %v1452_v53 = vpop.eup %1451 }
 0x168   :  { %1459 = vrcp.f32 %v726_v48  ;;  %v565_v50 = vpop.f32.mrf.mxu1  ;;  %v1454_v56 = vpop.eup %1453  ;;  %v462_v7 = vpack.c.bf16 %v1452_v53, %v1450_v51 }
 0x169   :  { %v566_v52 = vadd.f32 %v1853_v35, %v565_v50  ;;  %1461 = vpow2.f32 %v671_v49  ;;  %v1456_v58 = vpop.eup %1455  ;;  %v413_v2 = vadd.f32 1.0, %v1454_v56 }
 0x16a   :  { %v1458_v59 = vpop.eup %1457  ;;  %v414_v4 = vadd.f32 1.0, %v1456_v58 }
 0x16b   :  { %v632_v57 = vsub.f32 0.0, %v566_v52 }
 0x16d   :  { %v673_v60 = vmul.f32 1.442695, %v632_v57 }
 0x16e   :  { %v1460_v62 = vpop.eup %1459 }
 0x16f   :  { %1463 = vpow2.f32 %v673_v60  ;;  %v786_v0 = vpack.c.bf16 %v1460_v62, %v1458_v59  ;;  %v1462_v1 = vpop.eup %1461 }
 0x170   :  { %v568_v3 = vpop.f32.mrf.mxu1  ;;  %v727_v9 = vadd.f32 1.0, %v1462_v1  ;;  %1465 = vrcp.f32 %v413_v2 }
 0x171   :  { %v569_v5 = vadd.f32 %v1853_v35, %v568_v3  ;;  %1271 = vmatmul.msk.bf16.gmra.mxu2 %vm485_vm1, %v786_v0  ;;  %1467 = vrcp.f32 %v414_v4 }
 0x172   :  { %1469 = vpow2.f32 %v381_v8 }
 0x173   :  { %v633_v10 = vsub.f32 0.0, %v569_v5  ;;  %1257 = vmatmul.msk.bf16.gmra.mxu3 %vm485_vm1, %v462_v7  ;;  %1471 = vrcp.f32 %v727_v9 }
 0x175   :  { %v1464_v11 = vpop.eup %1463  ;;  %v675_v14 = vmul.f32 1.442695, %v633_v10 }
 0x176   :  { %v728_v13 = vadd.f32 1.0, %v1464_v11  ;;  %v1466_v17 = vpop.eup %1465 }
 0x177   :  { %v1468_v18 = vpop.eup %1467 }
 0x178   :  { %1473 = vrcp.f32 %v728_v13  ;;  %v570_v15 = vpop.f32.mrf.mxu1  ;;  %v1470_v20 = vpop.eup %1469  ;;  %v463_v30 = vpack.c.bf16 %v1468_v18, %v1466_v17 }
 0x179   :  { %1475 = vpow2.f32 %v383_v12  ;;  %v571_v16 = vadd.f32 %v1853_v35, %v570_v15  ;;  %v1472_v21 = vpop.eup %1471  ;;  %v415_v28 = vadd.f32 1.0, %v1470_v20 }
 0x17a   :  { %1477 = vpow2.f32 %v675_v14 }
 0x17b   :  { %v634_v19 = vsub.f32 0.0, %v571_v16 }
 0x17d   :  { %v677_v22 = vmul.f32 1.442695, %v634_v19 }
 0x17e   :  { %v1474_v23 = vpop.eup %1473 }
 0x17f   :  { %v1476_v24 = vpop.eup %1475  ;;  %1479 = vpow2.f32 %v677_v22  ;;  %v787_v25 = vpack.c.bf16 %v1474_v23, %v1472_v21 }
 0x180   :  { %v1478_v26 = vpop.eup %1477  ;;  %v573_v27 = vpop.f32.mrf.mxu1  ;;  %v416_v31 = vadd.f32 1.0, %v1476_v24  ;;  %1481 = vrcp.f32 %v415_v28 }
 0x181   :  { %v574_v29 = vadd.f32 %v1853_v35, %v573_v27  ;;  %1272 = vmatmul.msk.bf16.gmra.mxu2 %vm485_vm1, %v787_v25  ;;  %v729_v32 = vadd.f32 1.0, %v1478_v26 }
 0x182   :  { %1483 = vrcp.f32 %v416_v31 }
 0x183   :  { %v635_v33 = vsub.f32 0.0, %v574_v29  ;;  %1258 = vmatmul.msk.bf16.gmra.mxu3 %vm485_vm1, %v463_v30  ;;  %1485 = vrcp.f32 %v729_v32  ;;  %v1908_v32 = vld [vmem:[%s2063_s6] ss:$0 sm:$0xff] }
 0x185   :  { %v1480_v34 = vpop.eup %1479  ;;  %v679_v37 = vmul.f32 1.442695, %v635_v33 }
 0x186   :  { %v730_v36 = vadd.f32 1.0, %v1480_v34  ;;  %v1482_v40 = vpop.eup %1481 }
 0x188   :  { %1487 = vrcp.f32 %v730_v36  ;;  %v575_v38 = vpop.f32.mrf.mxu1  ;;  %v1484_v42 = vpop.eup %1483 }
 0x189   :  { %v576_v39 = vadd.f32 %v1853_v35, %v575_v38  ;;  %1489 = vpow2.f32 %v679_v37  ;;  %v1486_v43 = vpop.eup %1485  ;;  %v464_v50 = vpack.c.bf16 %v1484_v42, %v1482_v40 }
 0x18b   :  { %v636_v41 = vsub.f32 0.0, %v576_v39 }
 0x18d   :  { %v681_v44 = vmul.f32 1.442695, %v636_v41 }
 0x18e   :  { %v1488_v45 = vpop.eup %1487 }
 0x18f   :  { %1491 = vpow2.f32 %v681_v44  ;;  %v788_v46 = vpack.c.bf16 %v1488_v45, %v1486_v43  ;;  %v1490_v47 = vpop.eup %1489 }
 0x190   :  { %v578_v48 = vpop.f32.mrf.mxu1  ;;  %v731_v51 = vadd.f32 1.0, %v1490_v47 }
 0x191   :  { %v579_v49 = vadd.f32 %v1853_v35, %v578_v48  ;;  %1273 = vmatmul.msk.bf16.gmra.mxu2 %vm485_vm1, %v788_v46 }
 0x192   :  { %1493 = vrcp.f32 %v731_v51 }
 0x193   :  { %v637_v52 = vsub.f32 0.0, %v579_v49  ;;  %1259 = vmatmul.msk.bf16.gmra.mxu3 %vm485_vm1, %v464_v50 }
 0x195   :  { %v1492_v53 = vpop.eup %1491  ;;  %v683_v55 = vmul.f32 1.442695, %v637_v52 }
 0x196   :  { %v732_v54 = vadd.f32 1.0, %v1492_v53 }
 0x198   :  { %1495 = vrcp.f32 %v732_v54  ;;  %v580_v56 = vpop.f32.mrf.mxu1  ;;  %v1494_v59 = vpop.eup %1493 }
 0x199   :  { %v581_v57 = vadd.f32 %v1853_v35, %v580_v56  ;;  %1497 = vpow2.f32 %v683_v55 }
 0x19b   :  { %v638_v58 = vsub.f32 0.0, %v581_v57 }
 0x19d   :  { %v685_v60 = vmul.f32 1.442695, %v638_v58 }
 0x19e   :  { %v1496_v61 = vpop.eup %1495 }
 0x19f   :  { %1499 = vpow2.f32 %v685_v60  ;;  %v789_v62 = vpack.c.bf16 %v1496_v61, %v1494_v59  ;;  %v1498_v63 = vpop.eup %1497 }
 0x1a0   :  { %v583_v0 = vpop.f32.mrf.mxu1  ;;  %v733_v2 = vadd.f32 1.0, %v1498_v63 }
 0x1a1   :  { %v584_v1 = vadd.f32 %v1853_v35, %v583_v0  ;;  %1274 = vmatmul.msk.bf16.gmra.mxu2 %vm485_vm1, %v789_v62 }
 0x1a2   :  { %1501 = vrcp.f32 %v733_v2 }
 0x1a3   :  { %v639_v3 = vsub.f32 0.0, %v584_v1 }
 0x1a5   :  { %v1500_v4 = vpop.eup %1499  ;;  %v687_v6 = vmul.f32 1.442695, %v639_v3 }
 0x1a6   :  { %v734_v5 = vadd.f32 1.0, %v1500_v4 }
 0x1a8   :  { %1503 = vrcp.f32 %v734_v5  ;;  %v585_v7 = vpop.f32.mrf.mxu1  ;;  %v1502_v10 = vpop.eup %1501 }
 0x1a9   :  { %v586_v8 = vadd.f32 %v1853_v35, %v585_v7  ;;  %1505 = vpow2.f32 %v687_v6 }
 0x1ab   :  { %v640_v9 = vsub.f32 0.0, %v586_v8 }
 0x1ad   :  { %v689_v11 = vmul.f32 1.442695, %v640_v9 }
 0x1ae   :  { %v1504_v12 = vpop.eup %1503 }
 0x1af   :  { %1507 = vpow2.f32 %v689_v11  ;;  %v790_v13 = vpack.c.bf16 %v1504_v12, %v1502_v10  ;;  %v1506_v14 = vpop.eup %1505 }
 0x1b0   :  { %v588_v15 = vpop.f32.mrf.mxu1  ;;  %v735_v17 = vadd.f32 1.0, %v1506_v14 }
 0x1b1   :  { %v589_v16 = vadd.f32 %v1853_v35, %v588_v15  ;;  %1275 = vmatmul.msk.bf16.gmra.mxu2 %vm485_vm1, %v790_v13 }
 0x1b2   :  { %1509 = vrcp.f32 %v735_v17 }
 0x1b3   :  { %v641_v18 = vsub.f32 0.0, %v589_v16 }
 0x1b5   :  { %v1508_v19 = vpop.eup %1507  ;;  %v691_v21 = vmul.f32 1.442695, %v641_v18 }
 0x1b6   :  { %v736_v20 = vadd.f32 1.0, %v1508_v19 }
 0x1b8   :  { %1511 = vrcp.f32 %v736_v20  ;;  %v590_v22 = vpop.f32.mrf.mxu1  ;;  %v1510_v25 = vpop.eup %1509 }
 0x1b9   :  { %v591_v23 = vadd.f32 %v1853_v35, %v590_v22  ;;  %1513 = vpow2.f32 %v691_v21 }
 0x1bb   :  { %v642_v24 = vsub.f32 0.0, %v591_v23 }
 0x1bd   :  { %v693_v26 = vmul.f32 1.442695, %v642_v24 }
 0x1be   :  { %v1512_v27 = vpop.eup %1511 }
 0x1bf   :  { %1515 = vpow2.f32 %v693_v26  ;;  %v791_v28 = vpack.c.bf16 %v1512_v27, %v1510_v25  ;;  %v1514_v29 = vpop.eup %1513 }
 0x1c0   :  { %v593_v30 = vpop.f32.mrf.mxu1  ;;  %v737_v33 = vadd.f32 1.0, %v1514_v29 }
 0x1c1   :  { %v594_v31 = vadd.f32 %v1853_v35, %v593_v30  ;;  %1276 = vmatmul.msk.bf16.gmra.mxu2 %vm485_vm1, %v791_v28 }
 0x1c2   :  { %1517 = vrcp.f32 %v737_v33 }
 0x1c3   :  { %v643_v34 = vsub.f32 0.0, %v594_v31 }
 0x1c4   :  { %v876_v36 = vpop.f32.mrf.mxu2 }
 0x1c5   :  { %v1516_v37 = vpop.eup %1515  ;;  %v877_v38 = vadd.f32 %v1908_v32, %v876_v36  ;;  %v695_v40 = vmul.f32 1.442695, %v643_v34 }
 0x1c6   :  { %v738_v39 = vadd.f32 1.0, %v1516_v37 }
 0x1c7   :  { %v956_v41 = vsub.f32 0.0, %v877_v38 }
 0x1c8   :  { %1519 = vrcp.f32 %v738_v39  ;;  %v595_v42 = vpop.f32.mrf.mxu1  ;;  %v1518_v47 = vpop.eup %1517 }
 0x1c9   :  { %v988_v43 = vmul.f32 1.442695, %v956_v41  ;;  %v596_v44 = vadd.f32 %v1853_v35, %v595_v42  ;;  %1521 = vpow2.f32 %v695_v40 }
 0x1cb   :  { %1523 = vpow2.f32 %v988_v43  ;;  %v644_v45 = vsub.f32 0.0, %v596_v44 }
 0x1cc   :  { %v878_v46 = vpop.f32.mrf.mxu2 }
 0x1cd   :  { %v697_v48 = vmul.f32 1.442695, %v644_v45  ;;  %v879_v49 = vadd.f32 %v1908_v32, %v878_v46 }
 0x1ce   :  { %v1520_v50 = vpop.eup %1519 }
 0x1cf   :  { %1525 = vpow2.f32 %v697_v48  ;;  %v957_v51 = vsub.f32 0.0, %v879_v49  ;;  %v792_v52 = vpack.c.bf16 %v1520_v50, %v1518_v47  ;;  %v1522_v53 = vpop.eup %1521 }
 0x1d0   :  { %v598_v54 = vpop.f32.mrf.mxu1  ;;  %v739_v59 = vadd.f32 1.0, %v1522_v53 }
 0x1d1   :  { %v1524_v55 = vpop.eup %1523  ;;  %v990_v56 = vmul.f32 1.442695, %v957_v51  ;;  %v599_v57 = vadd.f32 %v1853_v35, %v598_v54  ;;  %1277 = vmatmul.msk.bf16.gmra.mxu2 %vm485_vm1, %v792_v52 }
 0x1d2   :  { %v1052_v58 = vadd.f32 1.0, %v1524_v55 }
 0x1d3   :  { %1527 = vpow2.f32 %v990_v56  ;;  %v645_v60 = vsub.f32 0.0, %v599_v57 }
 0x1d4   :  { %1529 = vrcp.f32 %v1052_v58  ;;  %v881_v61 = vpop.f32.mrf.mxu2 }
 0x1d5   :  { %v1526_v62 = vpop.eup %1525  ;;  %v882_v63 = vadd.f32 %v1908_v32, %v881_v61  ;;  %v699_v1 = vmul.f32 1.442695, %v645_v60  ;;  %1531 = vrcp.f32 %v739_v59 }
 0x1d6   :  { %v740_v0 = vadd.f32 1.0, %v1526_v62 }
 0x1d7   :  { %v958_v2 = vsub.f32 0.0, %v882_v63 }
 0x1d8   :  { %1533 = vrcp.f32 %v740_v0  ;;  %v600_v3 = vpop.f32.mrf.mxu1 }
 0x1d9   :  { %v1528_v4 = vpop.eup %1527  ;;  %v992_v5 = vmul.f32 1.442695, %v958_v2  ;;  %v601_v6 = vadd.f32 %v1853_v35, %v600_v3  ;;  %1535 = vpow2.f32 %v699_v1 }
 0x1da   :  { %v1530_v7 = vpop.eup %1529  ;;  %v1053_v8 = vadd.f32 1.0, %v1528_v4 }
 0x1db   :  { %1116 = vst [vmem:[%s2064_s7] sm:$0xff] %v1530_v7  ;;  %1537 = vpow2.f32 %v992_v5  ;;  %v646_v9 = vsub.f32 0.0, %v601_v6  ;;  %v1532_v11 = vpop.eup %1531 }
 0x1dc   :  { %1539 = vrcp.f32 %v1053_v8  ;;  %v883_v10 = vpop.f32.mrf.mxu2 }
 0x1dd   :  { %v701_v12 = vmul.f32 1.442695, %v646_v9  ;;  %v884_v13 = vadd.f32 %v1908_v32, %v883_v10 }
 0x1de   :  { %v1534_v14 = vpop.eup %1533 }
 0x1df   :  { %1541 = vpow2.f32 %v701_v12  ;;  %v959_v15 = vsub.f32 0.0, %v884_v13  ;;  %v793_v16 = vpack.c.bf16 %v1534_v14, %v1532_v11  ;;  %v1536_v17 = vpop.eup %1535 }
 0x1e0   :  { %v741_v22 = vadd.f32 1.0, %v1536_v17 }
 0x1e1   :  { %v1538_v18 = vpop.eup %1537  ;;  %v994_v19 = vmul.f32 1.442695, %v959_v15  ;;  %1278 = vmatmul.msk.bf16.gmra.mxu2 %vm485_vm1, %v793_v16 }
 0x1e2   :  { %v1540_v20 = vpop.eup %1539  ;;  %v1054_v21 = vadd.f32 1.0, %v1538_v18 }
 0x1e3   :  { %1117 = vst [vmem:[%s2064_s7 + $0x8] sm:$0xff] %v1540_v20  ;;  %1543 = vpow2.f32 %v994_v19 }
 0x1e4   :  { %1545 = vrcp.f32 %v1054_v21  ;;  %v886_v23 = vpop.f32.mrf.mxu2 }
 0x1e5   :  { %v1542_v24 = vpop.eup %1541  ;;  %v887_v25 = vadd.f32 %v1908_v32, %v886_v23  ;;  %1547 = vrcp.f32 %v741_v22 }
 0x1e6   :  { %v742_v26 = vadd.f32 1.0, %v1542_v24  ;;  %v603_v27 = vpop.f32.mrf.mxu3 }
 0x1e7   :  { %v960_v28 = vsub.f32 0.0, %v887_v25  ;;  %v604_v29 = vadd.f32 %v1853_v35, %v603_v27 }
 0x1e8   :  { %1549 = vrcp.f32 %v742_v26 }
 0x1e9   :  { %v1544_v30 = vpop.eup %1543  ;;  %v996_v31 = vmul.f32 1.442695, %v960_v28  ;;  %v647_v33 = vsub.f32 0.0, %v604_v29 }
 0x1ea   :  { %v1546_v34 = vpop.eup %1545  ;;  %v1055_v36 = vadd.f32 1.0, %v1544_v30 }
 0x1eb   :  { %1118 = vst [vmem:[%s2064_s7 + $0x10] sm:$0xff] %v1546_v34  ;;  %1551 = vpow2.f32 %v996_v31  ;;  %v703_v37 = vmul.f32 1.442695, %v647_v33  ;;  %v1548_v39 = vpop.eup %1547 }
 0x1ec   :  { %1553 = vrcp.f32 %v1055_v36  ;;  %v888_v38 = vpop.f32.mrf.mxu2 }
 0x1ed   :  { %v889_v40 = vadd.f32 %v1908_v32, %v888_v38  ;;  %1555 = vpow2.f32 %v703_v37 }
 0x1ee   :  { %v1550_v41 = vpop.eup %1549  ;;  %v605_v42 = vpop.f32.mrf.mxu3 }
 0x1ef   :  { %v961_v43 = vsub.f32 0.0, %v889_v40  ;;  %v606_v44 = vadd.f32 %v1853_v35, %v605_v42  ;;  %v794_v45 = vpack.c.bf16 %v1550_v41, %v1548_v39 }
 0x1f1   :  { %v1552_v46 = vpop.eup %1551  ;;  %v998_v47 = vmul.f32 1.442695, %v961_v43  ;;  %v648_v48 = vsub.f32 0.0, %v606_v44  ;;  %1279 = vmatmul.msk.bf16.gmra.mxu2 %vm485_vm1, %v794_v45 }
 0x1f2   :  { %v1554_v49 = vpop.eup %1553  ;;  %v1056_v50 = vadd.f32 1.0, %v1552_v46 }
 0x1f3   :  { %1119 = vst [vmem:[%s2064_s7 + $0x18] sm:$0xff] %v1554_v49  ;;  %1557 = vpow2.f32 %v998_v47  ;;  %v705_v51 = vmul.f32 1.442695, %v648_v48  ;;  %v1556_v54 = vpop.eup %1555 }
 0x1f4   :  { %1559 = vrcp.f32 %v1056_v50  ;;  %v891_v52 = vpop.f32.mrf.mxu2  ;;  %v743_v59 = vadd.f32 1.0, %v1556_v54 }
 0x1f5   :  { %1561 = vpow2.f32 %v705_v51  ;;  %v892_v53 = vadd.f32 %v1908_v32, %v891_v52  ;;  %v1697_v52 = vld [vmem:[%s2061_s4] ss:$0 sm:$0xff] }
 0x1f6   :  { %v608_v55 = vpop.f32.mrf.mxu3 }
 0x1f7   :  { %v962_v56 = vsub.f32 0.0, %v892_v53  ;;  %v609_v57 = vadd.f32 %v1853_v35, %v608_v55 }
 0x1f9   :  { %v1558_v58 = vpop.eup %1557  ;;  %v1000_v60 = vmul.f32 1.442695, %v962_v56  ;;  %v649_v61 = vsub.f32 0.0, %v609_v57 }
 0x1fa   :  { %v1560_v62 = vpop.eup %1559  ;;  %v1057_v63 = vadd.f32 1.0, %v1558_v58 }
 0x1fb   :  { %v1562_v0 = vpop.eup %1561  ;;  %1120 = vst [vmem:[%s2064_s7 + $0x20] sm:$0xff] %v1560_v62  ;;  %1563 = vpow2.f32 %v1000_v60  ;;  %v707_v2 = vmul.f32 1.442695, %v649_v61 }
 0x1fc   :  { %1565 = vrcp.f32 %v1057_v63  ;;  %v744_v1 = vadd.f32 1.0, %v1562_v0  ;;  %v893_v3 = vpop.f32.mrf.mxu2 }
 0x1fd   :  { %1567 = vrcp.f32 %v743_v59  ;;  %v894_v4 = vadd.f32 %v1908_v32, %v893_v3 }
 0x1fe   :  { %1569 = vrcp.f32 %v744_v1  ;;  %v610_v5 = vpop.f32.mrf.mxu3 }
 0x1ff   :  { %v963_v6 = vsub.f32 0.0, %v894_v4  ;;  %v611_v7 = vadd.f32 %v1853_v35, %v610_v5  ;;  %1571 = vpow2.f32 %v707_v2 }
 0x201   :  { %v1564_v8 = vpop.eup %1563  ;;  %v1002_v9 = vmul.f32 1.442695, %v963_v6  ;;  %v650_v10 = vsub.f32 0.0, %v611_v7 }
 0x202   :  { %v1566_v11 = vpop.eup %1565  ;;  %v1058_v12 = vadd.f32 1.0, %v1564_v8 }
 0x203   :  { %v1568_v13 = vpop.eup %1567  ;;  %1121 = vst [vmem:[%s2064_s7 + $0x28] sm:$0xff] %v1566_v11  ;;  %1573 = vpow2.f32 %v1002_v9  ;;  %v709_v14 = vmul.f32 1.442695, %v650_v10 }
 0x204   :  { %v1570_v15 = vpop.eup %1569  ;;  %1575 = vrcp.f32 %v1058_v12  ;;  %v896_v16 = vpop.f32.mrf.mxu2 }
 0x205   :  { %v795_v17 = vpack.c.bf16 %v1570_v15, %v1568_v13  ;;  %1577 = vpow2.f32 %v709_v14  ;;  %v897_v18 = vadd.f32 %v1908_v32, %v896_v16  ;;  %v1572_v19 = vpop.eup %1571 }
 0x206   :  { %v613_v20 = vpop.f32.mrf.mxu3  ;;  %v745_v24 = vadd.f32 1.0, %v1572_v19 }
 0x207   :  { %v964_v21 = vsub.f32 0.0, %v897_v18  ;;  %v614_v22 = vadd.f32 %v1853_v35, %v613_v20  ;;  %1280 = vmatmul.msk.bf16.vlgmr.msra.gmra.mxu3 %vm485_vm1, %v795_v17 }
 0x209   :  { %v1574_v23 = vpop.eup %1573  ;;  %v1004_v25 = vmul.f32 1.442695, %v964_v21  ;;  %v651_v26 = vsub.f32 0.0, %v614_v22 }
 0x20a   :  { %v1576_v27 = vpop.eup %1575  ;;  %v1059_v28 = vadd.f32 1.0, %v1574_v23 }
 0x20b   :  { %v1578_v29 = vpop.eup %1577  ;;  %1122 = vst [vmem:[%s2064_s7 + $0x30] sm:$0xff] %v1576_v27  ;;  %1579 = vpow2.f32 %v1004_v25  ;;  %v711_v31 = vmul.f32 1.442695, %v651_v26 }
 0x20c   :  { %1581 = vrcp.f32 %v1059_v28  ;;  %v746_v30 = vadd.f32 1.0, %v1578_v29  ;;  %v898_v33 = vpop.f32.mrf.mxu2 }
 0x20d   :  { %1583 = vrcp.f32 %v745_v24  ;;  %v899_v34 = vadd.f32 %v1908_v32, %v898_v33 }
 0x20e   :  { %1585 = vrcp.f32 %v746_v30  ;;  %v615_v36 = vpop.f32.mrf.mxu3 }
 0x20f   :  { %v965_v37 = vsub.f32 0.0, %v899_v34  ;;  %v616_v38 = vadd.f32 %v1853_v35, %v615_v36  ;;  %1587 = vpow2.f32 %v711_v31 }
 0x211   :  { %v1580_v39 = vpop.eup %1579  ;;  %v1006_v40 = vmul.f32 1.442695, %v965_v37  ;;  %v652_v41 = vsub.f32 0.0, %v616_v38 }
 0x212   :  { %v1582_v42 = vpop.eup %1581  ;;  %v1060_v43 = vadd.f32 1.0, %v1580_v39 }
 0x213   :  { %v1584_v44 = vpop.eup %1583  ;;  %1123 = vst [vmem:[%s2064_s7 + $0x38] sm:$0xff] %v1582_v42  ;;  %1589 = vpow2.f32 %v1006_v40  ;;  %v713_v45 = vmul.f32 1.442695, %v652_v41 }
 0x214   :  { %v1586_v46 = vpop.eup %1585  ;;  %1591 = vrcp.f32 %v1060_v43  ;;  %v901_v47 = vpop.f32.mrf.mxu2 }
 0x215   :  { %1593 = vpow2.f32 %v713_v45  ;;  %v902_v48 = vadd.f32 %v1908_v32, %v901_v47  ;;  %v796_v35 = vpack.c.bf16 %v1586_v46, %v1584_v44  ;;  %v1588_v49 = vpop.eup %1587 }
 0x216   :  { %v618_v50 = vpop.f32.mrf.mxu3  ;;  %v747_v55 = vadd.f32 1.0, %v1588_v49 }
 0x217   :  { %v966_v51 = vsub.f32 0.0, %v902_v48  ;;  %v619_v53 = vadd.f32 %v1697_v52, %v618_v50  ;;  %1281 = vmatmul.msk.bf16.gmra.mxu3 %vm485_vm1, %v796_v35 }
 0x219   :  { %v1590_v54 = vpop.eup %1589  ;;  %v1008_v56 = vmul.f32 1.442695, %v966_v51  ;;  %v653_v57 = vsub.f32 0.0, %v619_v53 }
 0x21a   :  { %v1592_v58 = vpop.eup %1591  ;;  %v1061_v59 = vadd.f32 1.0, %v1590_v54 }
 0x21b   :  { %v1594_v60 = vpop.eup %1593  ;;  %1124 = vst [vmem:[%s2064_s7 + $0x40] sm:$0xff] %v1592_v58  ;;  %1595 = vpow2.f32 %v1008_v56  ;;  %v715_v62 = vmul.f32 1.442695, %v653_v57 }
 0x21c   :  { %1597 = vrcp.f32 %v1061_v59  ;;  %v748_v61 = vadd.f32 1.0, %v1594_v60  ;;  %v903_v63 = vpop.f32.mrf.mxu2 }
 0x21d   :  { %1599 = vrcp.f32 %v747_v55  ;;  %v904_v0 = vadd.f32 %v1908_v32, %v903_v63 }
 0x21e   :  { %1601 = vrcp.f32 %v748_v61  ;;  %v620_v1 = vpop.f32.mrf.mxu3 }
 0x21f   :  { %v967_v2 = vsub.f32 0.0, %v904_v0  ;;  %v621_v3 = vadd.f32 %v1697_v52, %v620_v1  ;;  %1603 = vpow2.f32 %v715_v62 }
 0x221   :  { %v1596_v4 = vpop.eup %1595  ;;  %v1010_v5 = vmul.f32 1.442695, %v967_v2  ;;  %v654_v6 = vsub.f32 0.0, %v621_v3 }
 0x222   :  { %v1598_v7 = vpop.eup %1597  ;;  %v1062_v8 = vadd.f32 1.0, %v1596_v4 }
 0x223   :  { %v1600_v9 = vpop.eup %1599  ;;  %1125 = vst [vmem:[%s2064_s7 + $0x48] sm:$0xff] %v1598_v7  ;;  %1605 = vpow2.f32 %v1010_v5  ;;  %v717_v10 = vmul.f32 1.442695, %v654_v6 }
 0x224   :  { %v1602_v11 = vpop.eup %1601  ;;  %1607 = vrcp.f32 %v1062_v8  ;;  %v906_v12 = vpop.f32.mrf.mxu2 }
 0x225   :  { %1609 = vpow2.f32 %v717_v10  ;;  %v907_v13 = vadd.f32 %v1908_v32, %v906_v12  ;;  %v797_v14 = vpack.c.bf16 %v1602_v11, %v1600_v9  ;;  %v1604_v15 = vpop.eup %1603 }
 0x226   :  { %v749_v18 = vadd.f32 1.0, %v1604_v15 }
 0x227   :  { %v968_v16 = vsub.f32 0.0, %v907_v13  ;;  %1282 = vmatmul.msk.bf16.gmra.mxu3 %vm485_vm1, %v797_v14 }
 0x229   :  { %v1606_v17 = vpop.eup %1605  ;;  %v1012_v19 = vmul.f32 1.442695, %v968_v16 }
 0x22a   :  { %v1608_v20 = vpop.eup %1607  ;;  %v1063_v21 = vadd.f32 1.0, %v1606_v17 }
 0x22b   :  { %v1610_v22 = vpop.eup %1609  ;;  %1126 = vst [vmem:[%s2064_s7 + $0x50] sm:$0xff] %v1608_v20  ;;  %1611 = vpow2.f32 %v1012_v19 }
 0x22c   :  { %1613 = vrcp.f32 %v1063_v21  ;;  %v750_v23 = vadd.f32 1.0, %v1610_v22  ;;  %v908_v24 = vpop.f32.mrf.mxu2 }
 0x22d   :  { %1615 = vrcp.f32 %v749_v18  ;;  %v909_v25 = vadd.f32 %v1908_v32, %v908_v24 }
 0x22e   :  { %1617 = vrcp.f32 %v750_v23 }
 0x22f   :  { %v969_v26 = vsub.f32 0.0, %v909_v25 }
 0x231   :  { %v1612_v27 = vpop.eup %1611  ;;  %v1014_v28 = vmul.f32 1.442695, %v969_v26 }
 0x232   :  { %v1614_v29 = vpop.eup %1613  ;;  %v1064_v30 = vadd.f32 1.0, %v1612_v27 }
 0x233   :  { %v1616_v31 = vpop.eup %1615  ;;  %1127 = vst [vmem:[%s2064_s7 + $0x58] sm:$0xff] %v1614_v29  ;;  %1619 = vpow2.f32 %v1014_v28 }
 0x234   :  { %v1618_v33 = vpop.eup %1617  ;;  %1621 = vrcp.f32 %v1064_v30  ;;  %v911_v34 = vpop.f32.mrf.mxu2 }
 0x235   :  { %v912_v36 = vadd.f32 %v1908_v32, %v911_v34  ;;  %v798_v37 = vpack.c.bf16 %v1618_v33, %v1616_v31 }
 0x237   :  { %v970_v38 = vsub.f32 0.0, %v912_v36  ;;  %1283 = vmatmul.msk.bf16.gmra.mxu3 %vm485_vm1, %v798_v37 }
 0x239   :  { %v1620_v39 = vpop.eup %1619  ;;  %v1016_v40 = vmul.f32 1.442695, %v970_v38 }
 0x23a   :  { %v1622_v41 = vpop.eup %1621  ;;  %v1065_v42 = vadd.f32 1.0, %v1620_v39 }
 0x23b   :  { %1128 = vst [vmem:[%s2064_s7 + $0x60] sm:$0xff] %v1622_v41  ;;  %1623 = vpow2.f32 %v1016_v40 }
 0x23c   :  { %1625 = vrcp.f32 %v1065_v42  ;;  %v913_v43 = vpop.f32.mrf.mxu2 }
 0x23d   :  { %v914_v44 = vadd.f32 %v1908_v32, %v913_v43 }
 0x23f   :  { %v971_v45 = vsub.f32 0.0, %v914_v44 }
 0x241   :  { %v1624_v46 = vpop.eup %1623  ;;  %v1018_v47 = vmul.f32 1.442695, %v971_v45 }
 0x242   :  { %v1626_v48 = vpop.eup %1625  ;;  %v1066_v35 = vadd.f32 1.0, %v1624_v46 }
 0x243   :  { %1129 = vst [vmem:[%s2064_s7 + $0x68] sm:$0xff] %v1626_v48  ;;  %1627 = vpow2.f32 %v1018_v47 }
 0x244   :  { %1629 = vrcp.f32 %v1066_v35  ;;  %v916_v49 = vpop.f32.mrf.mxu2 }
 0x245   :  { %v917_v50 = vadd.f32 %v1908_v32, %v916_v49 }
 0x247   :  { %v972_v51 = vsub.f32 0.0, %v917_v50 }
 0x249   :  { %v1628_v52 = vpop.eup %1627  ;;  %v1020_v53 = vmul.f32 1.442695, %v972_v51 }
 0x24a   :  { %v1630_v54 = vpop.eup %1629  ;;  %v1067_v55 = vadd.f32 1.0, %v1628_v52 }
 0x24b   :  { %1130 = vst [vmem:[%s2064_s7 + $0x70] sm:$0xff] %v1630_v54  ;;  %1631 = vpow2.f32 %v1020_v53 }
 0x24c   :  { %1633 = vrcp.f32 %v1067_v55  ;;  %v918_v56 = vpop.f32.mrf.mxu2 }
 0x24d   :  { %v919_v57 = vadd.f32 %v1908_v32, %v918_v56 }
 0x24f   :  { %v973_v58 = vsub.f32 0.0, %v919_v57 }
 0x251   :  { %v1632_v59 = vpop.eup %1631  ;;  %v1022_v60 = vmul.f32 1.442695, %v973_v58 }
 0x252   :  { %v1634_v61 = vpop.eup %1633  ;;  %v1068_v62 = vadd.f32 1.0, %v1632_v59 }
 0x253   :  { %1131 = vst [vmem:[%s2064_s7 + $0x78] sm:$0xff] %v1634_v61  ;;  %1635 = vpow2.f32 %v1022_v60 }
 0x254   :  { %1637 = vrcp.f32 %v1068_v62  ;;  %v921_v63 = vpop.f32.mrf.mxu2 }
 0x255   :  { %v922_v0 = vadd.f32 %v1908_v32, %v921_v63 }
 0x257   :  { %v974_v1 = vsub.f32 0.0, %v922_v0 }
 0x259   :  { %v1636_v2 = vpop.eup %1635  ;;  %v1024_v3 = vmul.f32 1.442695, %v974_v1 }
 0x25a   :  { %v1638_v4 = vpop.eup %1637  ;;  %v1069_v5 = vadd.f32 1.0, %v1636_v2 }
 0x25b   :  { %1132 = vst [vmem:[%s2064_s7 + $0x80] sm:$0xff] %v1638_v4  ;;  %1639 = vpow2.f32 %v1024_v3 }
 0x25c   :  { %1641 = vrcp.f32 %v1069_v5  ;;  %v923_v6 = vpop.f32.mrf.mxu2 }
 0x25d   :  { %v924_v7 = vadd.f32 %v1908_v32, %v923_v6 }
 0x25f   :  { %v975_v8 = vsub.f32 0.0, %v924_v7 }
 0x261   :  { %v1640_v9 = vpop.eup %1639  ;;  %v1026_v10 = vmul.f32 1.442695, %v975_v8 }
 0x262   :  { %v1642_v11 = vpop.eup %1641  ;;  %v1070_v12 = vadd.f32 1.0, %v1640_v9 }
 0x263   :  { %1133 = vst [vmem:[%s2064_s7 + $0x88] sm:$0xff] %v1642_v11  ;;  %1643 = vpow2.f32 %v1026_v10 }
 0x264   :  { %1645 = vrcp.f32 %v1070_v12  ;;  %v926_v13 = vpop.f32.mrf.mxu2 }
 0x265   :  { %v927_v14 = vadd.f32 %v1908_v32, %v926_v13 }
 0x267   :  { %v976_v15 = vsub.f32 0.0, %v927_v14 }
 0x269   :  { %v1644_v16 = vpop.eup %1643  ;;  %v1028_v17 = vmul.f32 1.442695, %v976_v15 }
 0x26a   :  { %v1646_v18 = vpop.eup %1645  ;;  %v1071_v19 = vadd.f32 1.0, %v1644_v16 }
 0x26b   :  { %1134 = vst [vmem:[%s2064_s7 + $0x90] sm:$0xff] %v1646_v18  ;;  %1647 = vpow2.f32 %v1028_v17 }
 0x26c   :  { %1649 = vrcp.f32 %v1071_v19  ;;  %v928_v20 = vpop.f32.mrf.mxu2 }
 0x26d   :  { %v929_v21 = vadd.f32 %v1908_v32, %v928_v20 }
 0x26f   :  { %v977_v22 = vsub.f32 0.0, %v929_v21 }
 0x271   :  { %v1648_v23 = vpop.eup %1647  ;;  %v1030_v24 = vmul.f32 1.442695, %v977_v22 }
 0x272   :  { %v1650_v25 = vpop.eup %1649  ;;  %v1072_v26 = vadd.f32 1.0, %v1648_v23 }
 0x273   :  { %1135 = vst [vmem:[%s2064_s7 + $0x98] sm:$0xff] %v1650_v25  ;;  %1651 = vpow2.f32 %v1030_v24 }
 0x274   :  { %1653 = vrcp.f32 %v1072_v26  ;;  %v931_v27 = vpop.f32.mrf.mxu2 }
 0x275   :  { %v932_v28 = vadd.f32 %v1908_v32, %v931_v27 }
 0x277   :  { %v978_v29 = vsub.f32 0.0, %v932_v28 }
 0x279   :  { %v1652_v30 = vpop.eup %1651  ;;  %v1032_v31 = vmul.f32 1.442695, %v978_v29 }
 0x27a   :  { %v1654_v33 = vpop.eup %1653  ;;  %v1073_v34 = vadd.f32 1.0, %v1652_v30 }
 0x27b   :  { %1136 = vst [vmem:[%s2064_s7 + $0xa0] sm:$0xff] %v1654_v33  ;;  %1655 = vpow2.f32 %v1032_v31 }
 0x27c   :  { %1657 = vrcp.f32 %v1073_v34  ;;  %v933_v36 = vpop.f32.mrf.mxu2 }
 0x27d   :  { %v934_v37 = vadd.f32 %v1908_v32, %v933_v36 }
 0x27f   :  { %v979_v38 = vsub.f32 0.0, %v934_v37 }
 0x281   :  { %v1656_v39 = vpop.eup %1655  ;;  %v1034_v40 = vmul.f32 1.442695, %v979_v38 }
 0x282   :  { %v1658_v41 = vpop.eup %1657  ;;  %v1074_v42 = vadd.f32 1.0, %v1656_v39 }
 0x283   :  { %1137 = vst [vmem:[%s2064_s7 + $0xa8] sm:$0xff] %v1658_v41  ;;  %1659 = vpow2.f32 %v1034_v40 }
 0x284   :  { %1661 = vrcp.f32 %v1074_v42 }
 0x289   :  { %v1660_v43 = vpop.eup %1659 }
 0x28a   :  { %v1662_v44 = vpop.eup %1661  ;;  %v1075_v45 = vadd.f32 1.0, %v1660_v43  ;;  %v936_v46 = vpop.f32.mrf.mxu3 }
 0x28b   :  { %1138 = vst [vmem:[%s2064_s7 + $0xb0] sm:$0xff] %v1662_v44  ;;  %v937_v47 = vadd.f32 %v1908_v32, %v936_v46 }
 0x28c   :  { %1663 = vrcp.f32 %v1075_v45 }
 0x28d   :  { %v980_v48 = vsub.f32 0.0, %v937_v47 }
 0x28f   :  { %v1036_v35 = vmul.f32 1.442695, %v980_v48 }
 0x291   :  { %1665 = vpow2.f32 %v1036_v35 }
 0x292   :  { %v1664_v49 = vpop.eup %1663  ;;  %v938_v50 = vpop.f32.mrf.mxu3 }
 0x293   :  { %1139 = vst [vmem:[%s2064_s7 + $0xb8] sm:$0xff] %v1664_v49  ;;  %v939_v51 = vadd.f32 %v1908_v32, %v938_v50 }
 0x295   :  { %v981_v52 = vsub.f32 0.0, %v939_v51 }
 0x297   :  { %v1666_v53 = vpop.eup %1665  ;;  %v1038_v54 = vmul.f32 1.442695, %v981_v52 }
 0x298   :  { %v1076_v55 = vadd.f32 1.0, %v1666_v53 }
 0x299   :  { %1667 = vpow2.f32 %v1038_v54 }
 0x29a   :  { %1669 = vrcp.f32 %v1076_v55  ;;  %v941_v56 = vpop.f32.mrf.mxu3 }
 0x29b   :  { %v942_v57 = vadd.f32 %v1908_v32, %v941_v56 }
 0x29d   :  { %v982_v58 = vsub.f32 0.0, %v942_v57 }
 0x29f   :  { %v1668_v59 = vpop.eup %1667  ;;  %v1040_v60 = vmul.f32 1.442695, %v982_v58 }
 0x2a0   :  { %v1670_v61 = vpop.eup %1669  ;;  %v1077_v62 = vadd.f32 1.0, %v1668_v59 }
 0x2a1   :  { %1140 = vst [vmem:[%s2064_s7 + $0xc0] sm:$0xff] %v1670_v61  ;;  %1671 = vpow2.f32 %v1040_v60 }
 0x2a2   :  { %1673 = vrcp.f32 %v1077_v62  ;;  %v943_v63 = vpop.f32.mrf.mxu3 }
 0x2a3   :  { %v944_v0 = vadd.f32 %v1908_v32, %v943_v63 }
 0x2a5   :  { %v983_v1 = vsub.f32 0.0, %v944_v0 }
 0x2a7   :  { %v1672_v2 = vpop.eup %1671  ;;  %v1042_v3 = vmul.f32 1.442695, %v983_v1 }
 0x2a8   :  { %v1674_v4 = vpop.eup %1673  ;;  %v1078_v5 = vadd.f32 1.0, %v1672_v2 }
 0x2a9   :  { %1141 = vst [vmem:[%s2064_s7 + $0xc8] sm:$0xff] %v1674_v4  ;;  %1675 = vpow2.f32 %v1042_v3 }
 0x2aa   :  { %1677 = vrcp.f32 %v1078_v5  ;;  %v946_v6 = vpop.f32.mrf.mxu3 }
 0x2ab   :  { %v947_v7 = vadd.f32 %v1908_v32, %v946_v6 }
 0x2ad   :  { %v984_v8 = vsub.f32 0.0, %v947_v7 }
 0x2af   :  { %v1676_v9 = vpop.eup %1675  ;;  %v1044_v10 = vmul.f32 1.442695, %v984_v8 }
 0x2b0   :  { %v1678_v11 = vpop.eup %1677  ;;  %v1079_v12 = vadd.f32 1.0, %v1676_v9 }
 0x2b1   :  { %1142 = vst [vmem:[%s2064_s7 + $0xd0] sm:$0xff] %v1678_v11  ;;  %1679 = vpow2.f32 %v1044_v10 }
 0x2b2   :  { %1681 = vrcp.f32 %v1079_v12  ;;  %v948_v13 = vpop.f32.mrf.mxu3 }
 0x2b3   :  { %v949_v14 = vadd.f32 %v1908_v32, %v948_v13 }
 0x2b5   :  { %v985_v15 = vsub.f32 0.0, %v949_v14 }
 0x2b7   :  { %v1680_v16 = vpop.eup %1679  ;;  %v1046_v17 = vmul.f32 1.442695, %v985_v15 }
 0x2b8   :  { %v1682_v18 = vpop.eup %1681  ;;  %v1080_v19 = vadd.f32 1.0, %v1680_v16 }
 0x2b9   :  { %1143 = vst [vmem:[%s2064_s7 + $0xd8] sm:$0xff] %v1682_v18  ;;  %1683 = vpow2.f32 %v1046_v17 }
 0x2ba   :  { %1685 = vrcp.f32 %v1080_v19  ;;  %v951_v20 = vpop.f32.mrf.mxu3 }
 0x2bb   :  { %v952_v21 = vadd.f32 %v1908_v32, %v951_v20 }
 0x2bd   :  { %v986_v22 = vsub.f32 0.0, %v952_v21 }
 0x2bf   :  { %v1684_v23 = vpop.eup %1683  ;;  %v1048_v24 = vmul.f32 1.442695, %v986_v22 }
 0x2c0   :  { %v1686_v25 = vpop.eup %1685  ;;  %v1081_v26 = vadd.f32 1.0, %v1684_v23 }
 0x2c1   :  { %1144 = vst [vmem:[%s2064_s7 + $0xe0] sm:$0xff] %v1686_v25  ;;  %1687 = vpow2.f32 %v1048_v24 }
 0x2c2   :  { %1689 = vrcp.f32 %v1081_v26  ;;  %v953_v27 = vpop.f32.mrf.mxu3 }
 0x2c3   :  { %v954_v28 = vadd.f32 %v1908_v32, %v953_v27 }
 0x2c5   :  { %v987_v29 = vsub.f32 0.0, %v954_v28 }
 0x2c7   :  { %v1688_v30 = vpop.eup %1687  ;;  %v1050_v31 = vmul.f32 1.442695, %v987_v29 }
 0x2c8   :  { %v1690_v33 = vpop.eup %1689  ;;  %v1082_v34 = vadd.f32 1.0, %v1688_v30 }
 0x2c9   :  { %1145 = vst [vmem:[%s2064_s7 + $0xe8] sm:$0xff] %v1690_v33  ;;  %1691 = vpow2.f32 %v1050_v31 }
 0x2ca   :  { %1693 = vrcp.f32 %v1082_v34 }
 0x2cf   :  { %v1692_v36 = vpop.eup %1691 }
 0x2d0   :  { %v1694_v37 = vpop.eup %1693  ;;  %v1083_v38 = vadd.f32 1.0, %v1692_v36 }
 0x2d1   :  { %1146 = vst [vmem:[%s2064_s7 + $0xf0] sm:$0xff] %v1694_v37 }
 0x2d2   :  { %1695 = vrcp.f32 %v1083_v38 }
 0x2d8   :  { %v1696_v32 = vpop.eup %1695 }
 0x2d9   :  { %1147 = vst [vmem:[%s2064_s7 + $0xf8] sm:$0xff] %v1696_v32 }

</bundles_post_ra>
